<compile_context>
chip_gen: v7x
topology: tpu7x:2x2x1
jax: 0.10.0
libtpu: 0.0.40
codegen_flags: <defaults>
</compile_context>

<pallas_src>
from typing import NamedTuple

import jax
import jax.numpy as jnp
from jax.experimental import pallas as pl
from jax.experimental.pallas import tpu as pltpu


def _round_up(x: int, m: int) -> int:
    return ((x + m - 1) // m) * m


def _cdiv(a: int, b: int) -> int:
    return (a + b - 1) // b


def _vmem_cap_bytes() -> int:
    """Per-generation scoped-VMEM budget with headroom.

    v5e/v6e (128 MiB physical) -> ~100 MiB; v7x (64 MiB) -> 48 MiB.
    Falls back to a conservative 48 MiB (safe on every generation).
    """
    try:
        info = pltpu.get_tpu_info()
        for name in ("vmem_capacity_bytes", "vmem_bytes", "vmem_size_bytes"):
            cap = getattr(info, name, None)
            if cap:
                cap = int(cap)
                return int(min(cap - (16 << 20), int(0.8 * cap)))
    except Exception:
        pass
    return 48 << 20


def _divisor_tiles(hp: int):
    """All multiples of 128 that divide hp exactly (ascending)."""
    nb = hp // 128
    return [128 * d for d in range(1, nb + 1) if nb % d == 0]


# --------------------------------------------------------------------------
# Kernels
# --------------------------------------------------------------------------
def _matmul_bias_kernel(x_ref, w_ref, b_ref, o_ref, acc_ref):
    # out = x @ W' + b, with the residual identity already folded into W'.
    k = pl.program_id(2)

    @pl.when(k == 0)
    def _init():
        acc_ref[...] = jnp.broadcast_to(b_ref[...], acc_ref.shape)

    acc_ref[...] += jnp.dot(x_ref[...], w_ref[...],
                            preferred_element_type=jnp.float32)

    @pl.when(k == pl.num_programs(2) - 1)
    def _store():
        o_ref[...] = acc_ref[...].astype(o_ref.dtype)


def _matmul_bias_residual_kernel(x_ref, w_ref, b_ref, xres_ref, o_ref, acc_ref):
    # out = x @ W + b + x_res, residual kept in its original (f32) dtype.
    k = pl.program_id(2)

    @pl.when(k == 0)
    def _init():
        acc_ref[...] = (xres_ref[...].astype(jnp.float32)
                        + jnp.broadcast_to(b_ref[...], acc_ref.shape))

    acc_ref[...] += jnp.dot(x_ref[...], w_ref[...],
                            preferred_element_type=jnp.float32)

    @pl.when(k == pl.num_programs(2) - 1)
    def _store():
        o_ref[...] = acc_ref[...].astype(o_ref.dtype)


# --------------------------------------------------------------------------
# Host-side planning / prep
# --------------------------------------------------------------------------
class _PreparedParams(NamedTuple):
    w: jax.Array          # (Hp, Hp), op_dtype, identity folded if fold_identity
    b: jax.Array          # (1, Hp), float32
    H: int
    Hp: int
    op_dtype: jnp.dtype
    fold_identity: bool


def prepare_residual_linear(w, b, *, compute_dtype=None) -> _PreparedParams:
    """One-time (hoistable) weight/bias prep: cast, pad to 128 lanes, fold +I."""
    H = w.shape[0]
    assert w.shape == (H, H), "fn = Linear(hidden, hidden) expected"
    op_dtype = jnp.dtype(compute_dtype) if compute_dtype is not None else jnp.dtype(w.dtype)
    Hp = _round_up(H, 128)
    # Fold the residual identity into W only when it costs no precision
    # (no operand downcast).  Otherwise keep a separate f32 residual stream.
    fold_identity = op_dtype == jnp.dtype(w.dtype)
    w_p = w + jnp.eye(H, dtype=w.dtype) if fold_identity else w
    w_p = w_p.astype(op_dtype)
    b_p = jnp.reshape(b, (1, H)).astype(jnp.float32)
    if Hp != H:
        w_p = jnp.pad(w_p, ((0, Hp - H), (0, Hp - H)))
        b_p = jnp.pad(b_p, ((0, 0), (0, Hp - H)))
    return _PreparedParams(w_p, b_p, H, Hp, op_dtype, fold_identity)


def _plan_tiles(M, H, *, tm, tn, tk, op_dtype, x_dtype, out_dtype,
                with_residual_stream, cap):
    """Pick (tm_e, tn_e, tk_e, Mp, Hp, vmem_need) under the VMEM budget `cap`."""
    op_bytes = jnp.dtype(op_dtype).itemsize
    res_bytes = jnp.dtype(x_dtype).itemsize
    out_bytes = jnp.dtype(out_dtype).itemsize
    sub = max(8, 32 // op_bytes)              # sublane min: 8 f32, 16 bf16, 32 i8/fp8
    Hp = _round_up(H, 128)
    lane_tiles = _divisor_tiles(Hp)

    tm_e = max(sub, min(_round_up(tm, sub), _round_up(M, sub)))
    tn_cap = min(_round_up(tn, 128), Hp)
    tn_e = max(t for t in lane_tiles if t <= tn_cap)

    # v7x megacore: expose >=2 blocks on the parallel axes when possible.
    if _cdiv(M, tm_e) == 1 and Hp // tn_e == 1:
        if M >= 2 * sub:
            tm_e = _round_up(_cdiv(M, 2), sub)          # split rows: no extra padding
        else:
            smaller = [t for t in lane_tiles if t < tn_e]
            if smaller:
                tn_e = smaller[-1]

    def footprint(tm_e, tn_e, tk_e):
        in_b = (tm_e * tk_e + tk_e * tn_e) * op_bytes + 8 * tn_e * 4  # x, W, bias
        if with_residual_stream:
            in_b += tm_e * tn_e * res_bytes
        out_b = tm_e * tn_e * out_bytes
        acc_b = tm_e * tn_e * 4
        return 2 * (in_b + out_b) + acc_b          # double-buffered in/out + acc

    while True:
        tk_ok = [t for t in lane_tiles if footprint(tm_e, tn_e, t) <= cap]
        if tk_ok:
            if tk_ok[-1] == Hp:
                tk_e = Hp                           # resident W K-panel (K collapsed)
            else:
                tk_cap = min(_round_up(tk, 128), Hp)
                within = [t for t in tk_ok if t <= tk_cap]
                tk_e = within[-1] if within else tk_ok[-1]
            break
        # Nothing fits: shrink tiles instead of silently clamping the limit.
        if tn_e > 128:
            tn_e = max(t for t in lane_tiles if t <= tn_e // 2)
        elif tm_e > sub:
            tm_e = max(sub, _round_up(tm_e // 2, sub))
        else:
            tk_e = lane_tiles[0]                    # minimal tiles; last resort
            break

    Mp = _round_up(M, tm_e)
    need = footprint(tm_e, tn_e, tk_e)
    return tm_e, tn_e, tk_e, Mp, Hp, need


# --------------------------------------------------------------------------
# Public wrapper
# --------------------------------------------------------------------------
def residual_linear(x, w, b, *, compute_dtype=None, tm=512, tn=512, tk=1024,
                    force_pallas=False, prepared=None):
    """Pallas-fused Residual(Linear): out = x @ w + b + x.

    x: (M, H), w: (H, H), b: (H,) or (1, H).
    compute_dtype: optional MXU operand dtype (e.g. jnp.bfloat16); accumulation
      and the bias/residual epilogue stay in f32.
    prepared: output of prepare_residual_linear() to hoist W/b cast+pad+(+I).
    """
    M, H = x.shape
    assert w.shape == (H, H), "fn = Linear(hidden, hidden) expected"
    out_dtype = x.dtype

    # Small-shape escape hatch: padding to MXU tiles + grid overhead loses to
    # plain XLA fusion.  force_pallas=True still exercises the kernel.
    if not force_pallas and (H < 128 or M * H < (1 << 14)):
        b2 = jnp.reshape(b, (1, H))
        return (jnp.dot(x, w) + b2 + x).astype(out_dtype)

    if prepared is None:
        prepared = prepare_residual_linear(w, b, compute_dtype=compute_dtype)
    assert prepared.H == H
    op_dtype = prepared.op_dtype
    fold = prepared.fold_identity
    Hp = prepared.Hp

    cap = _vmem_cap_bytes()
    tm_e, tn_e, tk_e, Mp, Hp2, need = _plan_tiles(
        M, H, tm=tm, tn=tn, tk=tk, op_dtype=op_dtype, x_dtype=x.dtype,
        out_dtype=out_dtype, with_residual_stream=not fold, cap=cap)
    assert Hp2 == Hp

    # ---- pad activations (result is sliced back to (M, H)) ----
    x_mm = x.astype(op_dtype)
    if (Mp, Hp) != (M, H):
        x_mm = jnp.pad(x_mm, ((0, Mp - M), (0, Hp - H)))
    if not fold:
        x_res = x if (Mp, Hp) == (M, H) else jnp.pad(x, ((0, Mp - M), (0, Hp - H)))

    grid = (Mp // tm_e, Hp // tn_e, Hp // tk_e)
    vmem_limit = int(min(cap, max(32 << 20, need + (4 << 20))))

    x_spec = pl.BlockSpec((tm_e, tk_e), lambda i, j, k: (i, k))
    w_spec = pl.BlockSpec((tk_e, tn_e), lambda i, j, k: (k, j))
    b_spec = pl.BlockSpec((1, tn_e), lambda i, j, k: (0, j))
    o_spec = pl.BlockSpec((tm_e, tn_e), lambda i, j, k: (i, j))

    if fold:
        kernel = _matmul_bias_kernel
        in_specs = [x_spec, w_spec, b_spec]
        operands = (x_mm, prepared.w, prepared.b)
    else:
        xres_spec = pl.BlockSpec((tm_e, tn_e), lambda i, j, k: (i, j))
        kernel = _matmul_bias_residual_kernel
        in_specs = [x_spec, w_spec, b_spec, xres_spec]
        operands = (x_mm, prepared.w, prepared.b, x_res)

    out_padded = pl.pallas_call(
        kernel,
        out_shape=jax.ShapeDtypeStruct((Mp, Hp), out_dtype),
        grid_spec=pltpu.PrefetchScalarGridSpec(
            num_scalar_prefetch=0,
            grid=grid,
            in_specs=in_specs,
            out_specs=o_spec,
            scratch_shapes=[pltpu.VMEM((tm_e, tn_e), jnp.float32)],
        ),
        compiler_params=pltpu.CompilerParams(
            dimension_semantics=("parallel", "parallel", "arbitrary"),
            vmem_limit_bytes=vmem_limit,
        ),
    )(*operands)

    if (Mp, Hp) != (M, H):
        out_padded = out_padded[:M, :H]
    return out_padded


if __name__ == "__main__":
    key = jax.random.PRNGKey(0)
    k1, k2, k3, k4, k5 = jax.random.split(key, 5)

    # --- small shapes implied by the forward: batch=2, seq=8, hidden=32 ---
    batch, seq, hidden = 2, 8, 32
    x3 = jax.random.normal(k1, (batch, seq, hidden), dtype=jnp.float32)
    w = jax.random.normal(k2, (hidden, hidden), dtype=jnp.float32) / hidden**0.5
    b = jax.random.normal(k3, (1, hidden), dtype=jnp.float32) * 0.01

    x = x3.reshape(batch * seq, hidden)            # glue reshape in plain JAX
    ref = x @ w + b + x

    # 1) small shape through the Pallas kernel (padded to 128 lanes)
    out = jax.block_until_ready(residual_linear(x, w, b, force_pallas=True))
    assert out.shape == x.shape and out.dtype == x.dtype
    assert jnp.allclose(out, ref, atol=1e-4, rtol=1e-4), "small f32 mismatch"

    # 2) same shape through the small-shape escape hatch (plain XLA)
    out_fb = jax.block_until_ready(residual_linear(x, w, b))
    assert jnp.allclose(out_fb, ref, atol=1e-5, rtol=1e-5), "fallback mismatch"

    # 3) ragged row count (zero-pad + slice path)
    out_r = jax.block_until_ready(residual_linear(x[:13], w, b, force_pallas=True))
    assert out_r.shape == (13, hidden)
    assert jnp.allclose(out_r, ref[:13], atol=1e-4, rtol=1e-4), "ragged mismatch"

    # 4) MXU-relevant size, hoisted weight prep, f32 (identity folded into W)
    Mm, Hm = 256, 256
    xm = jax.random.normal(k4, (Mm, Hm), dtype=jnp.float32)
    wm = jax.random.normal(k5, (Hm, Hm), dtype=jnp.float32) / Hm**0.5
    bm = jnp.full((1, Hm), 0.01, dtype=jnp.float32)
    refm = xm @ wm + bm + xm
    prep = prepare_residual_linear(wm, bm)         # hoist cast/pad/+I once
    outm = jax.block_until_ready(residual_linear(xm, wm, bm, prepared=prep))
    assert jnp.allclose(outm, refm, atol=1e-3, rtol=1e-3), "f32 medium mismatch"

    # 5) bf16 MXU operands, f32 residual stream + accumulator (loose tolerance)
    outb = jax.block_until_ready(
        residual_linear(xm, wm, bm, compute_dtype=jnp.bfloat16))
    assert outb.dtype == xm.dtype
    assert jnp.allclose(outb, refm, atol=5e-2, rtol=5e-2), "bf16 medium mismatch"

    # restore the original layout (glue)
    _ = jax.block_until_ready(out.reshape(batch, seq, hidden))

    print("KERNEL_OK")
</pallas_src>

<mosaic_0001>
module attributes {stable_mosaic.version = 11 : i64} {
  func.func @_matmul_bias_kernel(%arg0: i32, %arg1: i32, %arg2: i32, %arg3: memref<8x128xf32, #tpu.memory_space<vmem>>, %arg4: memref<128x128xf32, #tpu.memory_space<vmem>>, %arg5: memref<1x128xf32, #tpu.memory_space<vmem>>, %arg6: memref<8x128xf32, #tpu.memory_space<vmem>>, %arg7: memref<8x128xf32, #tpu.memory_space<vmem>>) attributes {dimension_semantics = [#tpu.dimension_semantics<parallel>, #tpu.dimension_semantics<parallel>, #tpu.dimension_semantics<arbitrary>], iteration_bounds = array<i64: 2, 1, 1>, scalar_prefetch = 0 : i64, scratch_operands = 1 : i64, tpu.core_type = #tpu.core_type<tc>, window_params = [{transform_indices = @transform_0, window_bounds = array<i64: 8, 128>}, {transform_indices = @transform_1, window_bounds = array<i64: 128, 128>}, {transform_indices = @transform_2, window_bounds = array<i64: 1, 128>}, {transform_indices = @transform_3, window_bounds = array<i64: 8, 128>}]} {
    %c0_i32 = arith.constant 0 : i32
    %0 = arith.cmpi eq, %arg2, %c0_i32 : i32
    %1 = arith.extui %0 : i1 to i32
    %c0_i32_0 = arith.constant 0 : i32
    %2 = arith.cmpi ne, %1, %c0_i32_0 : i32
    scf.if %2 {
      %c0_10 = arith.constant 0 : index
      %c0_11 = arith.constant 0 : index
      %12 = vector.load %arg5[%c0_10, %c0_11] : memref<1x128xf32, #tpu.memory_space<vmem>>, vector<1x128xf32>
      %13 = vector.shape_cast %12 : vector<1x128xf32> to vector<1x128xf32>
      %14 = vector.broadcast %13 : vector<1x128xf32> to vector<8x128xf32>
      %c0_12 = arith.constant 0 : index
      %c0_13 = arith.constant 0 : index
      %15 = vector.load %arg7[%c0_12, %c0_13] : memref<8x128xf32, #tpu.memory_space<vmem>>, vector<8x128xf32>
      tpu.vector_store %arg7[%c0_12, %c0_13], %14 {strides = array<i32>} : memref<8x128xf32, #tpu.memory_space<vmem>>, vector<8x128xf32>,
    } else {
    }
    %c0 = arith.constant 0 : index
    %c0_1 = arith.constant 0 : index
    %3 = vector.load %arg7[%c0, %c0_1] : memref<8x128xf32, #tpu.memory_space<vmem>>, vector<8x128xf32>
    %c0_2 = arith.constant 0 : index
    %c0_3 = arith.constant 0 : index
    %4 = vector.load %arg3[%c0_2, %c0_3] : memref<8x128xf32, #tpu.memory_space<vmem>>, vector<8x128xf32>
    %c0_4 = arith.constant 0 : index
    %c0_5 = arith.constant 0 : index
    %5 = vector.load %arg4[%c0_4, %c0_5] : memref<128x128xf32, #tpu.memory_space<vmem>>, vector<128x128xf32>
    %cst = arith.constant dense<0.000000e+00> : vector<8x128xf32>
    %6 = tpu.matmul %4, %5, %cst {dimension_numbers = #tpu.dot_dimension_numbers<[1], [0], [0], [1], [0, 0, 1, 1], [], []>} : vector<8x128xf32>, vector<128x128xf32>, vector<8x128xf32> -> vector<8x128xf32>
    %7 = arith.addf %3, %6 : vector<8x128xf32>
    %c0_6 = arith.constant 0 : index
    %c0_7 = arith.constant 0 : index
    %8 = vector.load %arg7[%c0_6, %c0_7] : memref<8x128xf32, #tpu.memory_space<vmem>>, vector<8x128xf32>
    tpu.vector_store %arg7[%c0_6, %c0_7], %7 {strides = array<i32>} : memref<8x128xf32, #tpu.memory_space<vmem>>, vector<8x128xf32>,
    %c0_i32_8 = arith.constant 0 : i32
    %9 = arith.cmpi eq, %arg2, %c0_i32_8 : i32
    %10 = arith.extui %9 : i1 to i32
    %c0_i32_9 = arith.constant 0 : i32
    %11 = arith.cmpi ne, %10, %c0_i32_9 : i32
    scf.if %11 {
      %c0_10 = arith.constant 0 : index
      %c0_11 = arith.constant 0 : index
      %12 = vector.load %arg7[%c0_10, %c0_11] : memref<8x128xf32, #tpu.memory_space<vmem>>, vector<8x128xf32>
      %c0_12 = arith.constant 0 : index
      %c0_13 = arith.constant 0 : index
      %13 = vector.load %arg6[%c0_12, %c0_13] : memref<8x128xf32, #tpu.memory_space<vmem>>, vector<8x128xf32>
      tpu.vector_store %arg6[%c0_12, %c0_13], %12 {strides = array<i32>} : memref<8x128xf32, #tpu.memory_space<vmem>>, vector<8x128xf32>,
    } else {
    }
    return
  }
  func.func @transform_0(%arg0: i32, %arg1: i32, %arg2: i32) -> (i32, i32) {
    %c0_i32 = arith.constant 0 : i32
    return %arg0, %arg2 : i32, i32
  }
  func.func @transform_1(%arg0: i32, %arg1: i32, %arg2: i32) -> (i32, i32) {
    %c0_i32 = arith.constant 0 : i32
    return %arg2, %arg1 : i32, i32
  }
  func.func @transform_2(%arg0: i32, %arg1: i32, %arg2: i32) -> (i32, i32) {
    %c0_i32 = arith.constant 0 : i32
    %c0_i32_0 = arith.constant 0 : i32
    return %c0_i32, %arg1 : i32, i32
  }
  func.func @transform_3(%arg0: i32, %arg1: i32, %arg2: i32) -> (i32, i32) {
    %c0_i32 = arith.constant 0 : i32
    return %arg0, %arg1 : i32, i32
  }
}

</mosaic_0001>

<bundles_post_ra>
// kernel: tpu_custom_call.1
= control target key start
LH: loop header
LB: loop body
LE: loop exit
PB: predicated region body
PF: predicated region fallthrough
CT: control target
= control target key end

     0   :  { %8 = vsyncpa [#allocation4], 0  ;;  %s1051_s0 = inlined_call_operand.hbm [shape: f32[16,128], index: 0, kind: input, shape index: {}]   ;;  %s1052_s1 = inlined_call_operand.hbm [shape: f32[128,128], index: 1, kind: input, shape index: {}]   ;;  %s1053_s2 = inlined_call_operand.vmem [shape: f32[1,128], index: 2, kind: input, shape index: {}]   ;;  %s1054_s3 = inlined_call_operand.hbm [shape: f32[16,128], index: 3, kind: output, shape index: {}]  }
   0x1   :  { %10 = vsyncpa [#allocation4 + $0x1], 0 }
   0x2   :  { %11 = vsyncpa [#allocation7], 0 }
   0x3   :  { %12 = vsyncpa [#allocation5], 0 }
   0x4   :  { %14 = vsyncpa [#allocation5 + $0x1], 0  ;;  %s827_s12 = smov 0   ;;  %s829_s13 = smov 0  }
   0x5   :  { %s831_s14 = smov 0   ;;  %s833_s15 = smov 0  }
   0x6   :  { %s835_s16 = smov 0   ;;  %s837_s17 = smov 0  }
   0x7 LB: > { %s482_s18 = sadd.s32 4294967295, %s797_s17   ;;  %s483_s19 = sadd.s32 4294967294, %s797_s17   ;;  %s797_s17 = sphi %s837_s17, %s20_s17   ;;  %s793_s16 = sphi %s835_s16, %s1078_s16   ;;  %s789_s15 = sphi %s833_s15, %s1077_s15   ;;  %s785_s14 = sphi %s831_s14, %s1076_s14   ;;  %s781_s13 = sphi %s829_s13, %s1075_s13   ;;  %s777_s12 = sphi %s827_s12, %s1074_s12  }
   0x8   : > { %p61_p0 = scmp.ne.s32.totalorder %s781_s13, %s777_s12  ;;  %p861_p1 = scmp.eq.s32.totalorder %s482_s18, 0 }
   0x9   : > { %p865_p2 = scmp.eq.s32.totalorder %s482_s18, 1  ;;  %p147_p3 = scmp.eq.s32.totalorder %s483_s19, 1 }
   0xa   : > { %s1059_s20 = scalar_select %p861_p1, 1, 0 }
   0xb   : > { %s1060_s21 = scalar_select %p865_p2, 1, 0 }
   0xc   : > { %p871_p4 = por %p861_p1, %p61_p0  ;;  %p484_p5 = scmp.ge.s32.totalorder %s797_s17, 1 }
   0xd   : > { %p876_p6 = por %p147_p3, %p61_p0  ;;  %p154_p7 = scmp.lt.s32.totalorder %s797_s17, 3 }
   0xe   : > { %s1061_s22 = scalar_select %p871_p4, 1, 0 }
   0xf   : > { %s1062_s23 = scalar_select %p876_p6, 1, 0 }
  0x10   : > { %p881_p8 = pnand %p484_p5, %p154_p7  ;;  %s799_s25 = smov [#allocation6]  }
  0x11   : > { %s170_s26 = sshll.u32 %s799_s25, 4  ;;  %s39_s28 = sadd.s32 1, %s793_s16  ;;  %s171_s26 = int_to_ptr.vmem [resolvable:$true] %s170_s26 }
  0x12   : > { %s1063_s24 = scalar_select %p881_p8, 1, 0 }
  0x13   : > { %p583_p9 = pneg %p881_p8  ;;  %s653_s4 = scalar_lea.hbm %s1052_s1, 2048 }
  0x14   : > { %p654_p12 = scmp.ne.s32.totalorder %s1052_s1, %s653_s4  ;;  %p660_p5 = scmp.lt.u32.totalorder %s653_s4, %s1052_s1 }
  0x15   : > { %p890_p11 = pnand %p583_p9, %p861_p1 }
  0x17   : > { %p655_p13 = pneg %p890_p11 }
  0x19   : > { %p656_p0 = pnand %p655_p13, %p654_p12 }
  0x1b   : > { %p657_p3 = pneg %p656_p0 }
  0x1d   : > { %p662_p7 = pnand %p660_p5, %p657_p3 }
  0x1f   : > { %665 = shalt.err (!%p662_p7)
}
  0x20   : > { %s666_s9 = scalar_lea.vmem %s171_s26, 2048  ;;  %p674_p1 = scmp.lt.s32.totalorder %s171_s26, %s171_s26 }
  0x21   : > { %p667_p9 = scmp.ne.s32.totalorder %s171_s26, %s666_s9  ;;  %p675_p4 = scmp.lt.s32.totalorder %s666_s9, %s666_s9 }
  0x23   : > { %p669_p10 = pnand %p667_p9, %p655_p13  ;;  %p676_p8 = por %p675_p4, %p674_p1 }
  0x25   : > { %p670_p6 = pneg %p669_p10 }
  0x27   : > { %p677_p2 = pnand %p676_p8, %p670_p6 }
  0x29   : > { %680 = shalt.err (!%p677_p2)
}
  0x2a   : > { %s800_s10 = smov 128   ;;  %s801_s11 = smov 8  }
  0x2b   : > { %586 = dma.hbm_to_vmem [thread:$0]  (!%p890_p11), %s1052_s1, 2048, %s171_s26, [#allocation7], %s800_s10, %s800_s10, %s801_s11  }
  0x2c   : > { %p41_p1 = scmp.ge.s32.totalorder %s39_s28, 2  ;;  %s48_s25 = sadd.s32 1, %s785_s14 }
  0x2d   : > { %p55_p2 = scmp.ne.s32.totalorder %s785_s14, %s781_s13  ;;  %p56_p4 = scmp.eq.s32.totalorder %s797_s17, 0 }
  0x2e   : > { %s1080_s28 = smov (%p41_p1, %s39_s28), 0  ;;  %p1066_p8 = scmp.ne.s32.totalorder %s1060_s21, 0 }
  0x2f   : > { %p917_p6 = por %p56_p4, %p55_p2  ;;  %s43_s27 = ssub.s32 %s793_s16, %s1080_s28 }
  0x30   : > { %p923_p10 = por %p1066_p8, %p55_p2  ;;  %p596_p12 = scmp.lt.s32.totalorder %s797_s17, 2 }
  0x31   : > { %p46_p11 = scmp.eq.s32.totalorder %s43_s27, 0  ;;  %s190_s26 = sand.u32 1, %s785_s14  }
  0x32   : > { %s488_s4 = sshll.u32 %s190_s26, 3  ;;  %s489_s6 = sshll.u32 %s793_s16, 7 }
  0x33   : > { %s932_s5 = scalar_select %p46_p11, %s785_s14, %s48_s25  }
  0x34   : > { %s938_s9 = scalar_lea.hbm %s1051_s0, %s489_s6  ;;  %s194_s21 = scalar_lea.vmem [#allocation3], %s488_s4 }
  0x35   : > { %s202_s10 = sshll.u32 %s194_s21, 4  ;;  %p944_p13 = pnand %p596_p12, %p917_p6  ;;  %s940_s10 = int_to_ptr.vmem [resolvable:$true] %s202_s10 }
  0x36   : > { %s191_s18 = scalar_lea.sflag [#allocation4], %s190_s26  ;;  %s681_s19 = scalar_lea.hbm %s938_s9, 128 }
  0x37   : > { %p682_p0 = scmp.ne.s32.totalorder %s938_s9, %s681_s19  ;;  %p683_p3 = pneg %p944_p13 }
  0x38   : > { %s686_s4 = scalar_lea.hbm %s1051_s0, 256  ;;  %p687_p9 = scmp.lt.u32.totalorder %s938_s9, %s1051_s0 }
  0x39   : > { %p684_p5 = pnand %p683_p3, %p682_p0  ;;  %p688_p1 = scmp.lt.u32.totalorder %s686_s4, %s681_s19 }
  0x3a   : > { %p690_p4 = scmp.lt.u32.totalorder %s681_s19, %s938_s9 }
  0x3b   : > { %p685_p7 = pneg %p684_p5  ;;  %p689_p2 = por %p688_p1, %p687_p9 }
  0x3d   : > { %p691_p6 = por %p690_p4, %p689_p2 }
  0x3f   : > { %p692_p8 = pnand %p691_p6, %p685_p7 }
  0x41   : > { %695 = shalt.err (!%p692_p8)
}
  0x42   : > { %s696_s26 = scalar_lea.vmem %s940_s10, 128  ;;  %s802_s7 = smov [#allocation3]  }
  0x43   : > { %p697_p12 = scmp.ne.s32.totalorder %s940_s10, %s696_s26  ;;  %s701_s8 = sshll.u32 %s802_s7, 4  ;;  %s702_s8 = int_to_ptr.vmem [resolvable:$false] %s701_s8 }
  0x44   : > { %s703_s21 = scalar_lea.vmem %s702_s8, 256  ;;  %p704_p5 = scmp.lt.s32.totalorder %s940_s10, %s702_s8 }
  0x45   : > { %p699_p11 = pnand %p697_p12, %p683_p3  ;;  %p705_p9 = scmp.lt.s32.totalorder %s703_s21, %s696_s26 }
  0x47   : > { %p700_p0 = pneg %p699_p11  ;;  %p706_p1 = por %p705_p9, %p704_p5 }
  0x49   : > { %p707_p2 = pnand %p706_p1, %p700_p0 }
  0x4b   : > { %710 = shalt.err (!%p707_p2)
}
  0x4c   : > { %590 = dma.hbm_to_vmem [thread:$0]  (!%p944_p13), %s938_s9, 128, %s940_s10, %s191_s18  }
  0x4d   : > { %p1069_p7 = scmp.ne.s32.totalorder %s1063_s24, 0 }
  0x4e   : > { %s976_s19 = sand.u32 (!%p1069_p7), 1, %s781_s13   ;;  %p1070_p3 = scmp.ne.s32.totalorder (!%p1069_p7), %s1061_s22, 0 }
  0x4f   : > { %211 = sbr.rel (%p1069_p7) target bundleno = 353 (0x161), region = 32  ;;  %s491_s25 = sshll.u32 (!%p1069_p7), %s976_s19, 3 }
  0x50   : > { %s214_s27 = scalar_lea.sflag (!%p1069_p7), [#allocation4], %s976_s19  ;;  %s982_s4 = scalar_lea.vmem (!%p1069_p7), [#allocation3], %s491_s25 }
  0x56   : > { %764 = dma.done.wait (%p1070_p3), %s214_s27, 128  }
  0x57   : > { %766 = vsyncadd (%p1070_p3), %s214_s27, 4294967168  ;;  %p1071_p13 = scmp.ne.s32.totalorder %s1059_s20, 0 }
  0x59   : > { %768 = dma.done.wait (%p1071_p13), [#allocation7], 2048  }
  0x5a   : > { %770 = vsyncadd (%p1071_p13), [#allocation7], 4294965248  ;;  %v803_v0 = vmov 0.0|0.0   ;;  %vm804_vm0 = vmmov 0   ;;  %v805_v1 = vmov 0.0   ;;  %v265_v2 = vld [vmem:[#allocation6] sm:$0xff] }
  0x5b   : > { %551 = vmatprep.subr.bf16.mxu0 %v803_v0  ;;  %548 = vmatprep.mubr.msk.f32.mxu0 %vm804_vm0, %v805_v1  ;;  %v266_v3 = vld [vmem:[#allocation6 + $0x8] sm:$0xff]  ;;  %v267_v4 = vld [vmem:[#allocation6 + $0x10] sm:$0xff]  ;;  %v268_v6 = vld [vmem:[#allocation6 + $0x18] sm:$0xff]  ;;  %s496_s24 = sshll.u32 %s789_s15, 7  ;;  %s246_s9 = scalar_lea.vmem [#allocation8], %s491_s25 }
  0x5c   : > { %v552_v5 = vpack.c.bf16 %v266_v3, %v265_v2  ;;  %v555_v7 = vpack.c.bf16 %v268_v6, %v267_v4  ;;  %v269_v8 = vld [vmem:[#allocation6 + $0x20] sm:$0xff]  ;;  %v270_v9 = vld [vmem:[#allocation6 + $0x28] sm:$0xff]  ;;  %v271_v11 = vld [vmem:[#allocation6 + $0x30] sm:$0xff]  ;;  %s373_s10 = sshll.u32 %s246_s9, 4  ;;  %s1002_s29 = scalar_lea.hbm %s1054_s3, %s496_s24  ;;  %s1004_s10 = int_to_ptr.vmem [resolvable:$true] %s373_s10 }
  0x5d   : > { %v558_v10 = vpack.c.bf16 %v270_v9, %v269_v8  ;;  %v272_v12 = vld [vmem:[#allocation6 + $0x38] sm:$0xff]  ;;  %v273_v14 = vld [vmem:[#allocation6 + $0x40] sm:$0xff]  ;;  %v274_v15 = vld [vmem:[#allocation6 + $0x48] sm:$0xff]  ;;  %s359_s6 = scalar_lea.sflag [#allocation5], %s976_s19  ;;  %s711_s26 = scalar_lea.vmem %s1004_s10, 128 }
  0x5e   : > { %553 = vmatpush3.bf16.msra.mxu0 %v552_v5  ;;  %v561_v13 = vpack.c.bf16 %v272_v12, %v271_v11  ;;  %v564_v16 = vpack.c.bf16 %v274_v15, %v273_v14  ;;  %v275_v17 = vld [vmem:[#allocation6 + $0x50] sm:$0xff]  ;;  %v276_v18 = vld [vmem:[#allocation6 + $0x58] sm:$0xff]  ;;  %v277_v20 = vld [vmem:[#allocation6 + $0x60] sm:$0xff]  ;;  %p712_p4 = scmp.ne.s32.totalorder %s1004_s10, %s711_s26  ;;  %s806_s15 = smov [#allocation8]  }
  0x5f   : > { %554 = vmatprep.subr.bf16.mxu0 %v803_v0  ;;  %v567_v19 = vpack.c.bf16 %v276_v18, %v275_v17  ;;  %v278_v21 = vld [vmem:[#allocation6 + $0x68] sm:$0xff]  ;;  %v279_v23 = vld [vmem:[#allocation6 + $0x70] sm:$0xff]  ;;  %v280_v24 = vld [vmem:[#allocation6 + $0x78] sm:$0xff]  ;;  %s715_s7 = sshll.u32 %s806_s15, 4  ;;  %s716_s7 = int_to_ptr.vmem [resolvable:$false] %s715_s7 }
  0x60   : > { %v570_v22 = vpack.c.bf16 %v278_v21, %v277_v20  ;;  %v573_v25 = vpack.c.bf16 %v280_v24, %v279_v23  ;;  %v264_v26 = vld [vmem:[%s982_s4] sm:$0xff]  ;;  %p713_p6 = pnand %p712_p4, %p923_p10  ;;  %s717_s8 = scalar_lea.vmem %s716_s7, 256 }
  0x61   : > { %v494_v27 = vld [vmem:[%s1053_s2] ss:$0 sm:$0xff]  ;;  %p718_p12 = scmp.lt.s32.totalorder %s1004_s10, %s716_s7  ;;  %p719_p11 = scmp.lt.s32.totalorder %s717_s8, %s711_s26 }
  0x62   : > { %556 = vmatpush3.bf16.msra.mxu0 %v555_v7  ;;  %p714_p8 = pneg %p713_p6 }
  0x63   : > { %557 = vmatprep.subr.bf16.mxu0 %v803_v0  ;;  %p720_p0 = por %p719_p11, %p718_p12 }
  0x65   : > { %p721_p5 = pnand %p720_p0, %p714_p8 }
  0x66   : > { %559 = vmatpush3.bf16.msra.mxu0 %v558_v10 }
  0x67   : > { %560 = vmatprep.subr.bf16.mxu0 %v803_v0 }
  0x6a   : > { %562 = vmatpush3.bf16.msra.mxu0 %v561_v13 }
  0x6b   : > { %563 = vmatprep.subr.bf16.mxu0 %v803_v0 }
  0x6e   : > { %565 = vmatpush3.bf16.msra.mxu0 %v564_v16 }
  0x6f   : > { %566 = vmatprep.subr.bf16.mxu0 %v803_v0 }
  0x72   : > { %568 = vmatpush3.bf16.msra.mxu0 %v567_v19 }
  0x73   : > { %569 = vmatprep.subr.bf16.mxu0 %v803_v0 }
  0x76   : > { %571 = vmatpush3.bf16.msra.mxu0 %v570_v22 }
  0x77   : > { %572 = vmatprep.subr.bf16.mxu0 %v803_v0 }
  0x7a   : > { %574 = vmatpush3.bf16.msra.mxu0 %v573_v25 }
  0x7d   : > { %549 = vmatmul.mubr.f32.vlgmr.msra.gmra.mrb[0].mxu0 %v264_v26 }
 0x150   : > { %v347_v28 = vpop.f32.mrb[0].mxu0 }
 0x151   : > { %v351_v29 = vadd.f32 %v494_v27, %v347_v28  ;;  %v550_v30 = vpop.f32.mrb[1].mxu0 }
 0x153   : > { %357 = vst [vmem:[%s246_s9] sm:$0xff] %v351_v29 }
 0x154   : > { %724 = shalt.err (!%p721_p5)
}
 0x155   : > { %s725_s21 = scalar_lea.hbm %s1002_s29, 128  ;;  %s729_s27 = scalar_lea.hbm %s1054_s3, 256 }
 0x156   : > { %p726_p9 = scmp.ne.s32.totalorder %s1002_s29, %s725_s21  ;;  %p730_p7 = scmp.lt.u32.totalorder %s1002_s29, %s1054_s3 }
 0x157   : > { %p731_p3 = scmp.lt.u32.totalorder %s729_s27, %s725_s21  ;;  %p733_p4 = scmp.lt.u32.totalorder %s725_s21, %s1002_s29 }
 0x158   : > { %p727_p1 = pnand %p726_p9, %p923_p10 }
 0x159   : > { %p732_p13 = por %p731_p3, %p730_p7 }
 0x15a   : > { %p728_p2 = pneg %p727_p1 }
 0x15b   : > { %p734_p6 = por %p733_p4, %p732_p13 }
 0x15d   : > { %p735_p8 = pnand %p734_p6, %p728_p2 }
 0x15f   : > { %738 = shalt.err (!%p735_p8)
}
 0x160   : > { %581 = dma.vmem_to_hbm [thread:$0]  (%p923_p10), %s1004_s10, 128, %s1002_s29, %s359_s6  }
 0x161 PF: > { %s385_s22 = sand.u32 1, %s777_s12   ;;  %p1072_p12 = scmp.ne.s32.totalorder %s1062_s23, 0 }
 0x162   : > { %p1073_p11 = scmp.ge.s32.totalorder %s797_s17, 2  ;;  %s386_s24 = scalar_lea.sflag [#allocation5], %s385_s22 }
 0x164   : > { %p592_p0 = pnand %p1073_p11, %p1072_p12 }
 0x166   : > { %772 = dma.done.wait (!%p592_p0), %s386_s24, 128  }
 0x167   : > { %774 = vsyncadd (!%p592_p0), %s386_s24, 4294967168  ;;  %s20_s17 = sadd.s32 1, %s797_s17   ;;  %s1074_s12 = smov %s781_s13 }
 0x168   : > { %p17_p5 = scmp.ge.s32.totalorder %s20_s17, 4   ;;  %s1075_s13 = smov %s785_s14 }
 0x169   : > { %s1076_s14 = smov %s932_s5  ;;  %s1077_s15 = smov %s793_s16 }
 0x16a   : > { %s1078_s16 = smov %s1080_s28  ;;  %19 = sbr.rel (!%p17_p5) target bundleno = 7 (0x7), region = 93 }
 0x171   :  { %391 = vsyncpa [#allocation4], 1 }
 0x172   :  { %393 = vsyncpa [#allocation4 + $0x1], 1 }
 0x173   :  { %394 = vsyncpa [#allocation7], 1 }
 0x174   :  { %395 = vsyncpa [#allocation5], 1 }
 0x175   :  { %397 = vsyncpa [#allocation5 + $0x1], 1 }

</bundles_post_ra>
